<compile_context>
chip_gen: v5e
topology: v5e:2x2
jax: 0.10.0
libtpu: 0.0.40
codegen_flags: <defaults>
</compile_context>

<pallas_src>
import functools

import numpy as np

import jax
import jax.numpy as jnp
from jax.experimental import pallas as pl
from jax.experimental.pallas import tpu as pltpu


# ----------------------------------------------------------------------------
# one-time operator construction (geometry only, no x-dependent work)
# ----------------------------------------------------------------------------
def _bilinear_matrix(n_in, n_out):
    """(n_in, n_out) interpolation matrix, PyTorch bilinear align_corners=False."""
    m = np.zeros((n_in, n_out), np.float32)
    scale = n_in / n_out
    for q in range(n_out):
        src = max((q + 0.5) * scale - 0.5, 0.0)
        i0 = min(int(np.floor(src)), n_in - 1)
        i1 = min(i0 + 1, n_in - 1)
        l1 = src - i0
        m[i0, q] += 1.0 - l1
        m[i1, q] += l1
    return m


def _convt_tap_matrices(n_in, k=4, stride=2, pad=1):
    """0/1 tap matrices for ConvTranspose: out o gets input i at tap t iff o == stride*i - pad + t."""
    n_out = stride * n_in
    cols = np.zeros((k, n_in, n_out), np.float32)   # cols[t, i, o]
    rows = np.zeros((k, n_out, n_in), np.float32)   # rows[t, o, i]
    for t in range(k):
        for i in range(n_in):
            o = stride * i - pad + t
            if 0 <= o < n_out:
                cols[t, i, o] = 1.0
                rows[t, o, i] = 1.0
    return cols, rows


# ----------------------------------------------------------------------------
# the fused kernel: one grid step == one output channel (both branches)
# ----------------------------------------------------------------------------
def _upsample_kernel(dims, x_ref, a_ref, cb_ref, bias_ref, o_ref):
    K, Ho = dims

    # 1) ONE row matmul: the ConvTranspose row operators for all K column taps plus the
    #    bilinear row operator, stacked along the output rows.  Contraction = Cin*H,
    #    lanes = B*W, operator is the LHS (no batch broadcast).
    t = jnp.dot(a_ref[...], x_ref[...],
                preferred_element_type=jnp.float32)          # ((K+1)*Ho, B*W)

    # 2) Column matmuls.  RHS operators are kron(I_B, col_op) so batch stays on the
    #    lane axis; LHS slabs of `t` are sublane slices at multiples of Ho (8-aligned).
    #    ConvTranspose taps accumulate (MXU-result accumulation on v7x MRB).
    acc = jnp.dot(t[0:Ho, :], cb_ref[0], preferred_element_type=jnp.float32)
    for kx in range(1, K):
        acc = acc + jnp.dot(t[kx * Ho:(kx + 1) * Ho, :], cb_ref[kx],
                            preferred_element_type=jnp.float32)
    up = jnp.dot(t[K * Ho:(K + 1) * Ho, :], cb_ref[K],
                 preferred_element_type=jnp.float32)

    # 3) Folded biases added once at store time; both stores are lane-dense (B*Wo)
    #    and each output row is written exactly once.
    o_ref[0:Ho, :] = acc + bias_ref[0:Ho, :]        # conv branch rows
    o_ref[Ho:2 * Ho, :] = up + bias_ref[Ho:2 * Ho, :]   # up branch rows


# ----------------------------------------------------------------------------
# wrapper
# ----------------------------------------------------------------------------
def upsample_forward(x, wt, bt, wc, bc, wu, bu, up_factor=2):
    """Pallas forward of UpSample.

    x : (B, Cin, H, W) f32
    wt: (Cin, Cmid, 4, 4) ConvTranspose2d weight, bt: (Cmid,)
    wc: (Cmid, Cmid) 1x1 conv (conv branch),      bc: (Cmid,)
    wu: (Cmid, Cin)  1x1 conv (up branch),        bu: (Cmid,)
    returns (B, 2*Cmid, 2*H, 2*W)
    """
    assert up_factor == 2, "kernel packs k=4 / stride=2 / pad=1 geometry"
    B, Cin, H, W = x.shape
    Cmid, K = wt.shape[1], wt.shape[2]
    Cout = 2 * Cmid
    Ho, Wo = 2 * H, 2 * W
    assert Ho % 8 == 0, "sublane-aligned row slabs require Ho % 8 == 0"

    f32 = jnp.float32

    # ---- one-time packing: geometry + weights, with the 1x1 convs / biases folded ----
    _, rows_h = _convt_tap_matrices(H, k=K, stride=2, pad=1)   # rows_h[ky, oy, h]
    cols_w, _ = _convt_tap_matrices(W, k=K, stride=2, pad=1)   # cols_w[kx, w, ox]
    uh = _bilinear_matrix(H, Ho).T                             # (Ho, H)
    uw = _bilinear_matrix(W, Wo)                               # (W, Wo)

    # Row operators with the 1x1 convs folded in:
    #   conv: a_conv[p, kx, oy, c, h] = sum_{o,ky} wc[p,o] * wt[c,o,ky,kx] * rows_h[ky,oy,h]
    #   up:   a_up[p, oy, c, h]       = wu[p,c] * uh[oy,h]
    a_conv = jnp.einsum('po,cokl,kyh->plych', wc.astype(f32), wt.astype(f32),
                        jnp.asarray(rows_h))
    a_up = jnp.einsum('pc,yh->pych', wu.astype(f32), jnp.asarray(uh))
    a_all = jnp.concatenate([a_conv, a_up[:, None]], axis=1)      # (Cmid, K+1, Ho, Cin, H)
    a_all = a_all.reshape(Cmid * (K + 1) * Ho, Cin * H)

    # Column operators, block-diagonal over batch (batch lives on lanes).
    eye_b = np.eye(B, dtype=np.float32)
    cb = np.stack([np.kron(eye_b, cols_w[kx]) for kx in range(K)]
                  + [np.kron(eye_b, uw)], axis=0)                 # (K+1, B*W, B*Wo)

    # Folded biases (bc_eff = bc + wc @ bt), one value per kernel-output row.
    bc_eff = bc.astype(f32) + wc.astype(f32) @ bt.astype(f32)
    bias = jnp.stack([jnp.broadcast_to(bc_eff[:, None], (Cmid, Ho)),
                      jnp.broadcast_to(bu.astype(f32)[:, None], (Cmid, Ho))],
                     axis=1).reshape(Cmid * 2 * Ho, 1)

    # Batch folded into lanes: x -> (Cin*H, B*W).
    x_p = jnp.transpose(x.astype(f32), (1, 2, 0, 3)).reshape(Cin * H, B * W)

    kernel = functools.partial(_upsample_kernel, (K, Ho))
    out2d = pl.pallas_call(
        kernel,
        out_shape=jax.ShapeDtypeStruct((Cmid * 2 * Ho, B * Wo), f32),
        grid=(Cmid,),
        in_specs=[
            pl.BlockSpec((Cin * H, B * W), lambda i: (0, 0)),           # x (resident)
            pl.BlockSpec(((K + 1) * Ho, Cin * H), lambda i: (i, 0)),    # per-channel row-operator slab
            pl.BlockSpec((K + 1, B * W, B * Wo), lambda i: (0, 0, 0)),  # column operators (resident)
            pl.BlockSpec((2 * Ho, 1), lambda i: (i, 0)),                # per-channel folded biases
        ],
        out_specs=pl.BlockSpec((2 * Ho, B * Wo), lambda i: (i, 0)),
        compiler_params=pltpu.CompilerParams(
            dimension_semantics=("parallel",)),
    )(x_p, a_all, jnp.asarray(cb), bias)

    # (Cmid, branch, Ho, B, Wo) -> (B, branch, Cmid, Ho, Wo) -> NCHW with
    # channel order [conv(0..Cmid-1), up(0..Cmid-1)] == torch.cat([conv, up], dim=1).
    out = out2d.reshape(Cmid, 2, Ho, B, Wo).transpose(3, 1, 0, 2, 4)
    return out.reshape(B, Cout, Ho, Wo)


# ----------------------------------------------------------------------------
# independent reference (XLA ops, no Pallas)
# ----------------------------------------------------------------------------
def reference(x, wt, bt, wc, bc, wu, bu):
    B, Cin, H, W = x.shape
    Cmid = wt.shape[1]
    # ConvTranspose2d(k=4, s=2, p=1) == conv of the x2-zero-dilated input (pad=2)
    # with the spatially-flipped, (in,out)-swapped kernel.
    k_oihw = jnp.transpose(wt[:, :, ::-1, ::-1], (1, 0, 2, 3))
    y = jax.lax.conv_general_dilated(
        x, k_oihw, window_strides=(1, 1), padding=((2, 2), (2, 2)),
        lhs_dilation=(2, 2), rhs_dilation=(1, 1),
        dimension_numbers=('NCHW', 'OIHW', 'NCHW'))
    y = y + bt.reshape(1, Cmid, 1, 1)
    branch_conv = jnp.einsum('oc,bchw->bohw', wc, y) + bc.reshape(1, Cmid, 1, 1)

    up = jax.image.resize(x, (B, Cin, 2 * H, 2 * W), method='bilinear')
    branch_up = jnp.einsum('oc,bchw->bohw', wu, up) + bu.reshape(1, Cmid, 1, 1)
    return jnp.concatenate([branch_conv, branch_up], axis=1)


if __name__ == "__main__":
    key = jax.random.PRNGKey(0)
    B, Cin, Cout, H, W = 2, 4, 8, 16, 16
    Cmid = Cout // 2
    k = jax.random.split(key, 8)

    bnd_t = 1.0 / np.sqrt(Cin * 4 * 4)
    wt = jax.random.uniform(k[0], (Cin, Cmid, 4, 4), minval=-bnd_t, maxval=bnd_t, dtype=jnp.float32)
    bt = jax.random.uniform(k[1], (Cmid,), minval=-bnd_t, maxval=bnd_t, dtype=jnp.float32)
    bnd_c = 1.0 / np.sqrt(Cmid)
    wc = jax.random.uniform(k[2], (Cmid, Cmid), minval=-bnd_c, maxval=bnd_c, dtype=jnp.float32)
    bc = jax.random.uniform(k[3], (Cmid,), minval=-bnd_c, maxval=bnd_c, dtype=jnp.float32)
    bnd_u = 1.0 / np.sqrt(Cin)
    wu = jax.random.uniform(k[4], (Cmid, Cin), minval=-bnd_u, maxval=bnd_u, dtype=jnp.float32)
    bu = jax.random.uniform(k[5], (Cmid,), minval=-bnd_u, maxval=bnd_u, dtype=jnp.float32)

    x = jax.random.normal(k[6], (B, Cin, H, W), dtype=jnp.float32)

    out = upsample_forward(x, wt, bt, wc, bc, wu, bu)
    out = jax.block_until_ready(out)

    ref = reference(x, wt, bt, wc, bc, wu, bu)
    assert out.shape == (B, Cout, 2 * H, 2 * W)
    assert jnp.allclose(out, ref, atol=1e-4, rtol=1e-4), "mismatch vs reference"

    print("KERNEL_OK")
</pallas_src>

<mosaic_0001>
module attributes {stable_mosaic.version = 11 : i64} {
  func.func @_upsample_kernel(%arg0: i32, %arg1: memref<64x32xf32, #tpu.memory_space<vmem>>, %arg2: memref<160x64xf32, #tpu.memory_space<vmem>>, %arg3: memref<5x32x64xf32, #tpu.memory_space<vmem>>, %arg4: memref<64x1xf32, #tpu.memory_space<vmem>>, %arg5: memref<64x64xf32, #tpu.memory_space<vmem>>) attributes {dimension_semantics = [#tpu.dimension_semantics<parallel>], iteration_bounds = array<i64: 4>, scalar_prefetch = 0 : i64, scratch_operands = 0 : i64, tpu.core_type = #tpu.core_type<tc>, window_params = [{pipeline_mode = #tpu.pipeline_mode<synchronous>, transform_indices = @transform_0, window_bounds = array<i64: 64, 32>}, {transform_indices = @transform_1, window_bounds = array<i64: 160, 64>}, {pipeline_mode = #tpu.pipeline_mode<synchronous>, transform_indices = @transform_2, window_bounds = array<i64: 5, 32, 64>}, {transform_indices = @transform_3, window_bounds = array<i64: 64, 1>}, {transform_indices = @transform_4, window_bounds = array<i64: 64, 64>}]} {
    %c0 = arith.constant 0 : index
    %c0_0 = arith.constant 0 : index
    %0 = vector.load %arg2[%c0, %c0_0] : memref<160x64xf32, #tpu.memory_space<vmem>>, vector<160x64xf32>
    %c0_1 = arith.constant 0 : index
    %c0_2 = arith.constant 0 : index
    %1 = vector.load %arg1[%c0_1, %c0_2] : memref<64x32xf32, #tpu.memory_space<vmem>>, vector<64x32xf32>
    %cst = arith.constant dense<0.000000e+00> : vector<160x32xf32>
    %2 = tpu.matmul %0, %1, %cst {dimension_numbers = #tpu.dot_dimension_numbers<[1], [0], [0], [1], [0, 0, 1, 1], [], []>} : vector<160x64xf32>, vector<64x32xf32>, vector<160x32xf32> -> vector<160x32xf32>
    %3 = vector.extract_strided_slice %2 {offsets = [0, 0], sizes = [32, 32], strides = [1, 1]} : vector<160x32xf32> to vector<32x32xf32>
    %c0_3 = arith.constant 0 : index
    %c0_4 = arith.constant 0 : index
    %c0_5 = arith.constant 0 : index
    %4 = vector.load %arg3[%c0_3, %c0_4, %c0_5] : memref<5x32x64xf32, #tpu.memory_space<vmem>>, vector<1x32x64xf32>
    %5 = vector.shape_cast %4 : vector<1x32x64xf32> to vector<32x64xf32>
    %cst_6 = arith.constant dense<0.000000e+00> : vector<32x64xf32>
    %6 = tpu.matmul %3, %5, %cst_6 {dimension_numbers = #tpu.dot_dimension_numbers<[1], [0], [0], [1], [0, 0, 1, 1], [], []>} : vector<32x32xf32>, vector<32x64xf32>, vector<32x64xf32> -> vector<32x64xf32>
    %7 = vector.extract_strided_slice %2 {offsets = [32, 0], sizes = [32, 32], strides = [1, 1]} : vector<160x32xf32> to vector<32x32xf32>
    %c1 = arith.constant 1 : index
    %c0_7 = arith.constant 0 : index
    %c0_8 = arith.constant 0 : index
    %8 = vector.load %arg3[%c1, %c0_7, %c0_8] : memref<5x32x64xf32, #tpu.memory_space<vmem>>, vector<1x32x64xf32>
    %9 = vector.shape_cast %8 : vector<1x32x64xf32> to vector<32x64xf32>
    %cst_9 = arith.constant dense<0.000000e+00> : vector<32x64xf32>
    %10 = tpu.matmul %7, %9, %cst_9 {dimension_numbers = #tpu.dot_dimension_numbers<[1], [0], [0], [1], [0, 0, 1, 1], [], []>} : vector<32x32xf32>, vector<32x64xf32>, vector<32x64xf32> -> vector<32x64xf32>
    %11 = arith.addf %6, %10 : vector<32x64xf32>
    %12 = vector.extract_strided_slice %2 {offsets = [64, 0], sizes = [32, 32], strides = [1, 1]} : vector<160x32xf32> to vector<32x32xf32>
    %c2 = arith.constant 2 : index
    %c0_10 = arith.constant 0 : index
    %c0_11 = arith.constant 0 : index
    %13 = vector.load %arg3[%c2, %c0_10, %c0_11] : memref<5x32x64xf32, #tpu.memory_space<vmem>>, vector<1x32x64xf32>
    %14 = vector.shape_cast %13 : vector<1x32x64xf32> to vector<32x64xf32>
    %cst_12 = arith.constant dense<0.000000e+00> : vector<32x64xf32>
    %15 = tpu.matmul %12, %14, %cst_12 {dimension_numbers = #tpu.dot_dimension_numbers<[1], [0], [0], [1], [0, 0, 1, 1], [], []>} : vector<32x32xf32>, vector<32x64xf32>, vector<32x64xf32> -> vector<32x64xf32>
    %16 = arith.addf %11, %15 : vector<32x64xf32>
    %17 = vector.extract_strided_slice %2 {offsets = [96, 0], sizes = [32, 32], strides = [1, 1]} : vector<160x32xf32> to vector<32x32xf32>
    %c3 = arith.constant 3 : index
    %c0_13 = arith.constant 0 : index
    %c0_14 = arith.constant 0 : index
    %18 = vector.load %arg3[%c3, %c0_13, %c0_14] : memref<5x32x64xf32, #tpu.memory_space<vmem>>, vector<1x32x64xf32>
    %19 = vector.shape_cast %18 : vector<1x32x64xf32> to vector<32x64xf32>
    %cst_15 = arith.constant dense<0.000000e+00> : vector<32x64xf32>
    %20 = tpu.matmul %17, %19, %cst_15 {dimension_numbers = #tpu.dot_dimension_numbers<[1], [0], [0], [1], [0, 0, 1, 1], [], []>} : vector<32x32xf32>, vector<32x64xf32>, vector<32x64xf32> -> vector<32x64xf32>
    %21 = arith.addf %16, %20 : vector<32x64xf32>
    %22 = vector.extract_strided_slice %2 {offsets = [128, 0], sizes = [32, 32], strides = [1, 1]} : vector<160x32xf32> to vector<32x32xf32>
    %c4 = arith.constant 4 : index
    %c0_16 = arith.constant 0 : index
    %c0_17 = arith.constant 0 : index
    %23 = vector.load %arg3[%c4, %c0_16, %c0_17] : memref<5x32x64xf32, #tpu.memory_space<vmem>>, vector<1x32x64xf32>
    %24 = vector.shape_cast %23 : vector<1x32x64xf32> to vector<32x64xf32>
    %cst_18 = arith.constant dense<0.000000e+00> : vector<32x64xf32>
    %25 = tpu.matmul %22, %24, %cst_18 {dimension_numbers = #tpu.dot_dimension_numbers<[1], [0], [0], [1], [0, 0, 1, 1], [], []>} : vector<32x32xf32>, vector<32x64xf32>, vector<32x64xf32> -> vector<32x64xf32>
    %c0_19 = arith.constant 0 : index
    %c0_20 = arith.constant 0 : index
    %26 = vector.load %arg4[%c0_19, %c0_20] : memref<64x1xf32, #tpu.memory_space<vmem>>, vector<32x1xf32>
    %27 = vector.broadcast %26 : vector<32x1xf32> to vector<32x64xf32>
    %28 = arith.addf %21, %27 : vector<32x64xf32>
    %c0_21 = arith.constant 0 : index
    %c0_22 = arith.constant 0 : index
    %29 = vector.load %arg5[%c0_21, %c0_22] : memref<64x64xf32, #tpu.memory_space<vmem>>, vector<32x64xf32>
    tpu.vector_store %arg5[%c0_21, %c0_22], %28 {strides = array<i32>} : memref<64x64xf32, #tpu.memory_space<vmem>>, vector<32x64xf32>,
    %c32 = arith.constant 32 : index
    %c0_23 = arith.constant 0 : index
    %30 = vector.load %arg4[%c32, %c0_23] : memref<64x1xf32, #tpu.memory_space<vmem>>, vector<32x1xf32>
    %31 = vector.broadcast %30 : vector<32x1xf32> to vector<32x64xf32>
    %32 = arith.addf %25, %31 : vector<32x64xf32>
    %c32_24 = arith.constant 32 : index
    %c0_25 = arith.constant 0 : index
    %33 = vector.load %arg5[%c32_24, %c0_25] : memref<64x64xf32, #tpu.memory_space<vmem>>, vector<32x64xf32>
    tpu.vector_store %arg5[%c32_24, %c0_25], %32 {strides = array<i32>} : memref<64x64xf32, #tpu.memory_space<vmem>>, vector<32x64xf32>,
    return
  }
  func.func @transform_0(%arg0: i32) -> (i32, i32) {
    %c0_i32 = arith.constant 0 : i32
    %c0_i32_0 = arith.constant 0 : i32
    %c0_i32_1 = arith.constant 0 : i32
    return %c0_i32, %c0_i32_0 : i32, i32
  }
  func.func @transform_1(%arg0: i32) -> (i32, i32) {
    %c0_i32 = arith.constant 0 : i32
    %c0_i32_0 = arith.constant 0 : i32
    return %arg0, %c0_i32 : i32, i32
  }
  func.func @transform_2(%arg0: i32) -> (i32, i32, i32) {
    %c0_i32 = arith.constant 0 : i32
    %c0_i32_0 = arith.constant 0 : i32
    %c0_i32_1 = arith.constant 0 : i32
    %c0_i32_2 = arith.constant 0 : i32
    return %c0_i32, %c0_i32_0, %c0_i32_1 : i32, i32, i32
  }
  func.func @transform_3(%arg0: i32) -> (i32, i32) {
    %c0_i32 = arith.constant 0 : i32
    %c0_i32_0 = arith.constant 0 : i32
    return %arg0, %c0_i32 : i32, i32
  }
  func.func @transform_4(%arg0: i32) -> (i32, i32) {
    %c0_i32 = arith.constant 0 : i32
    %c0_i32_0 = arith.constant 0 : i32
    return %arg0, %c0_i32 : i32, i32
  }
}

</mosaic_0001>

<bundles_post_ra>
// kernel: tpu_custom_call.1
= control target key start
LH: loop header
LB: loop body
LE: loop exit
PB: predicated region body
PF: predicated region fallthrough
CT: control target
= control target key end

     0   :  { %s881_s15 = smov 0   ;;  %s1082_s0 = inlined_call_operand.vmem [shape: f32[64,32], index: 0, kind: input, shape index: {}]   ;;  %s1083_s1 = inlined_call_operand.vmem [shape: f32[640,64], index: 1, kind: input, shape index: {}]   ;;  %s1084_s2 = inlined_call_operand.vmem [shape: f32[5,32,64], index: 2, kind: input, shape index: {}]   ;;  %s1085_s3 = inlined_call_operand.vmem [shape: f32[256,1], index: 3, kind: input, shape index: {}]   ;;  %s1086_s4 = inlined_call_operand.vmem [shape: f32[256,64], index: 4, kind: output, shape index: {}]  }
   0x1 LB: > { %s755_s16 = sadd.s32 4294967295, %s853_s15   ;;  %p759_p0 = scmp.ge.s32.totalorder %s853_s15, 1  ;;  %s853_s15 = sphi %s881_s15, %s14_s15  }
   0x2   : > { %p174_p1 = scmp.lt.s32.totalorder %s853_s15, 5 }
   0x4   : > { %p175_p2 = pnand %p759_p0, %p174_p1 }
   0x5   : > { %s205_s21 = smul.u32 (!%p175_p2), 20, %s755_s16  ;;  %s761_s26 = sshll.u32 (!%p175_p2), %s755_s16, 3 }
   0x6   : > { %178 = sbr.rel (%p175_p2) target bundleno = 408 (0x198), region = 36  ;;  %p212_p4 = scmp.lt.s32.totalorder (!%p175_p2), %s761_s26, 31 }
   0x7   : > { %p206_p3 = scmp.lt.s32.totalorder (!%p175_p2), %s205_s21, 79 }
   0xb   : > { %v250_v0 = vld [vmem:[%s1082_s0 + $0x38] sm:$0xff]  ;;  %v249_v1 = vld [vmem:[%s1082_s0 + $0x30] sm:$0xff]  ;;  %v248_v2 = vld [vmem:[%s1082_s0 + $0x28] sm:$0xff]  ;;  %s1088_s21 = smov (!%p206_p3, %s205_s21), 79  ;;  %vm251_vm0 = vcmask 523264   ;;  %vm398_vm1 = vcmask 261120  }
   0xc   : > { %320 = vmatpush.msra.mxu0 %v250_v0  ;;  %823 = vmatpush.msra.mxu3 %v250_v0  ;;  %v247_v3 = vld [vmem:[%s1082_s0 + $0x20] sm:$0xff]  ;;  %v246_v4 = vld [vmem:[%s1082_s0 + $0x18] sm:$0xff]  ;;  %s760_s28 = sshll.u32 %s1088_s21, 3  ;;  %v245_v5 = vld [vmem:[%s1082_s0 + $0x10] sm:$0xff]  ;;  %s1090_s26 = smov (!%p212_p4, %s761_s26), 31  ;;  %v855_v61 = vmov 0  }
   0xd   : > { %v244_v6 = vld [vmem:[%s1082_s0 + $0x8] sm:$0xff]  ;;  %s915_s9 = scalar_lea.vmem %s1083_s1, %s760_s28  ;;  %v243_v7 = vld [vmem:[%s1082_s0] sm:$0xff]  ;;  %v788_v28 = vld [vmem:[%s1084_s2 + $0x38] sm:$0xff]  ;;  %845 = vset.pattern.permute.xlu1 %v855_v61  ;;  %844 = vset.pattern.permute.xlu0 %v855_v61  ;;  %s762_s16 = sshll.u32 %s1090_s26, 3 }
   0xe   : > { %321 = vmatpush.msra.mxu0 %v249_v1  ;;  %824 = vmatpush.msra.mxu3 %v249_v1  ;;  %v223_v8 = vld [vmem:[%s915_s9] sm:$0xff]  ;;  %v224_v9 = vld [vmem:[%s915_s9 + $0x8] sm:$0xff]  ;;  %v233_v10 = vld [vmem:[%s915_s9 + $0x50] sm:$0xff]  ;;  %s215_s7 = scalar_lea.vmem %s1085_s3, %s762_s16  ;;  %s1061_s10 = scalar_lea.vmem %s1086_s4, %s762_s16 }
   0xf   : > { %v225_v11 = vld [vmem:[%s915_s9 + $0x10] sm:$0xff]  ;;  %v234_v12 = vld [vmem:[%s915_s9 + $0x58] sm:$0xff]  ;;  %v235_v14 = vld [vmem:[%s915_s9 + $0x60] sm:$0xff]  ;;  %423 = vmatpush.msra.mxu1 %v788_v28  ;;  %831 = vmatpush.msra.mxu2 %v788_v28 }
  0x10   : > { %322 = vmatpush.msra.mxu0 %v248_v2  ;;  %825 = vmatpush.msra.mxu3 %v248_v2  ;;  %v226_v13 = vld [vmem:[%s915_s9 + $0x18] sm:$0xff]  ;;  %v227_v15 = vld [vmem:[%s915_s9 + $0x20] sm:$0xff]  ;;  %v236_v16 = vld [vmem:[%s915_s9 + $0x68] sm:$0xff] }
  0x11   : > { %v228_v17 = vld [vmem:[%s915_s9 + $0x28] sm:$0xff]  ;;  %v237_v18 = vld [vmem:[%s915_s9 + $0x70] sm:$0xff]  ;;  %v238_v20 = vld [vmem:[%s915_s9 + $0x78] sm:$0xff]  ;;  %846 = vset.pattern.permute.xlu2 %v855_v61 }
  0x12   : > { %323 = vmatpush.msra.mxu0 %v247_v3  ;;  %826 = vmatpush.msra.mxu3 %v247_v3  ;;  %v229_v19 = vld [vmem:[%s915_s9 + $0x30] sm:$0xff]  ;;  %v230_v21 = vld [vmem:[%s915_s9 + $0x38] sm:$0xff]  ;;  %v239_v22 = vld [vmem:[%s915_s9 + $0x80] sm:$0xff] }
  0x13   : > { %v231_v23 = vld [vmem:[%s915_s9 + $0x40] sm:$0xff]  ;;  %v240_v24 = vld [vmem:[%s915_s9 + $0x88] sm:$0xff]  ;;  %v241_v26 = vld [vmem:[%s915_s9 + $0x90] sm:$0xff] }
  0x14   : > { %324 = vmatpush.msra.mxu0 %v246_v4  ;;  %827 = vmatpush.msra.mxu3 %v246_v4  ;;  %v232_v25 = vld [vmem:[%s915_s9 + $0x48] sm:$0xff]  ;;  %v242_v27 = vld [vmem:[%s915_s9 + $0x98] sm:$0xff]  ;;  %v787_v29 = vld [vmem:[%s1084_s2 + $0x30] sm:$0xff] }
  0x15   : > { %v786_v30 = vld [vmem:[%s1084_s2 + $0x28] sm:$0xff]  ;;  %424 = vmatpush.msra.mxu1 %v787_v29  ;;  %832 = vmatpush.msra.mxu2 %v787_v29  ;;  %v785_v31 = vld [vmem:[%s1084_s2 + $0x20] sm:$0xff]  ;;  %v392_v34 = vld [vmem:[%s1084_s2 + $0x18] sm:$0xff] }
  0x16   : > { %325 = vmatpush.msra.mxu0 %v245_v5  ;;  %828 = vmatpush.msra.mxu3 %v245_v5  ;;  %v391_v35 = vld [vmem:[%s1084_s2 + $0x10] sm:$0xff]  ;;  %v390_v37 = vld [vmem:[%s1084_s2 + $0x8] sm:$0xff]  ;;  %v800_v39 = vld [vmem:[%s1084_s2 + $0x58] sm:$0xff] }
  0x17   : > { %425 = vmatpush.msra.mxu1 %v786_v30  ;;  %833 = vmatpush.msra.mxu2 %v786_v30  ;;  %v389_v40 = vld [vmem:[%s1084_s2] sm:$0xff]  ;;  %v799_v41 = vld [vmem:[%s1084_s2 + $0x50] sm:$0xff]  ;;  %v798_v42 = vld [vmem:[%s1084_s2 + $0x48] sm:$0xff] }
  0x18   : > { %326 = vmatpush.msra.mxu0 %v244_v6  ;;  %829 = vmatpush.msra.mxu3 %v244_v6  ;;  %v797_v44 = vld [vmem:[%s1084_s2 + $0x40] sm:$0xff]  ;;  %v808_v46 = vld [vmem:[%s1084_s2 + $0x78] sm:$0xff]  ;;  %v815_v50 = vld [vmem:[%s1084_s2 + $0x90] sm:$0xff] }
  0x19   : > { %426 = vmatpush.msra.mxu1 %v785_v31  ;;  %834 = vmatpush.msra.mxu2 %v785_v31  ;;  %v816_v48 = vld [vmem:[%s1084_s2 + $0x98] sm:$0xff]  ;;  %v807_v51 = vld [vmem:[%s1084_s2 + $0x70] sm:$0xff]  ;;  %v814_v54 = vld [vmem:[%s1084_s2 + $0x88] sm:$0xff] }
  0x1a   : > { %327 = vmatpush.msra.mxu0 %v243_v7  ;;  %830 = vmatpush.msra.mxu3 %v243_v7  ;;  %v806_v55 = vld [vmem:[%s1084_s2 + $0x68] sm:$0xff]  ;;  %v813_v57 = vld [vmem:[%s1084_s2 + $0x80] sm:$0xff]  ;;  %v588_v0 = vld [vmem:[%s215_s7 + $0x10] sm:$0xff] }
  0x1b   : > { %765 = vmatmul.msk.f32.vlgmr.msra.gmra.mxu0 %vm251_vm0, %v223_v8  ;;  %775 = vmatmul.msk.f32.vlgmr.msra.gmra.mxu3 %vm251_vm0, %v233_v10  ;;  %v805_v58 = vld [vmem:[%s1084_s2 + $0x60] sm:$0xff]  ;;  %v589_v3 = vld [vmem:[%s215_s7 + $0x18] sm:$0xff]  ;;  %v587_v4 = vld [vmem:[%s215_s7 + $0x8] sm:$0xff] }
  0x1c   : > { %464 = vmatpush.msrb.mxu2 %v392_v34  ;;  %510 = vmatpush.msrb.mxu1 %v800_v39  ;;  %v586_v1 = vld [vmem:[%s215_s7] sm:$0xff]  ;;  %v621_v6 = vld [vmem:[%s215_s7 + $0x38] sm:$0xff]  ;;  %v620_v7 = vld [vmem:[%s215_s7 + $0x30] sm:$0xff] }
  0x1d   : > { %602 = vperm.xlu1 %845, %v588_v0   ;;  %592 = vperm.xlu0 %844, %v586_v1   ;;  %v618_v8 = vld [vmem:[%s215_s7 + $0x20] sm:$0xff] }
  0x1e   : > { %465 = vmatpush.msrb.mxu2 %v391_v35  ;;  %511 = vmatpush.msrb.mxu1 %v799_v41 }
  0x1f   : > { %624 = vperm.xlu2 %846, %v618_v8  }
  0x20   : > { %466 = vmatpush.msrb.mxu2 %v390_v37  ;;  %512 = vmatpush.msrb.mxu1 %v798_v42 }
  0x22   : > { %467 = vmatpush.msrb.mxu2 %v389_v40  ;;  %513 = vmatpush.msrb.mxu1 %v797_v44 }
  0x23   : > { %766 = vmatmul.msk.f32.gmra.mxu0 %vm251_vm0, %v224_v9  ;;  %776 = vmatmul.msk.f32.gmra.mxu3 %vm251_vm0, %v234_v12  ;;  %v619_v9 = vld [vmem:[%s215_s7 + $0x28] sm:$0xff] }
  0x25   : > { %607 = vperm.xlu1 %845, %v589_v3   ;;  %597 = vperm.xlu0 %844, %v587_v4  }
  0x27   : > { %629 = vperm.xlu2 %846, %v619_v9  }
  0x2b   : > { %767 = vmatmul.msk.f32.gmra.mxu0 %vm251_vm0, %v225_v11  ;;  %777 = vmatmul.msk.f32.gmra.mxu3 %vm251_vm0, %v235_v14 }
  0x2d   : > { %639 = vperm.xlu1 %845, %v621_v6   ;;  %634 = vperm.xlu0 %844, %v620_v7  }
  0x33   : > { %768 = vmatmul.msk.f32.gmra.mxu0 %vm251_vm0, %v226_v13  ;;  %778 = vmatmul.msk.f32.gmra.mxu3 %vm251_vm0, %v236_v16 }
  0x3b   : > { %769 = vmatmul.msk.f32.gmra.mxu0 %vm251_vm0, %v227_v15  ;;  %779 = vmatmul.msk.f32.gmra.mxu3 %vm251_vm0, %v237_v18 }
  0x43   : > { %770 = vmatmul.msk.f32.gmra.mxu0 %vm251_vm0, %v228_v17  ;;  %780 = vmatmul.msk.f32.gmra.mxu3 %vm251_vm0, %v238_v20 }
  0x4b   : > { %771 = vmatmul.msk.f32.gmra.mxu0 %vm251_vm0, %v229_v19  ;;  %781 = vmatmul.msk.f32.gmra.mxu3 %vm251_vm0, %v239_v22 }
  0x53   : > { %772 = vmatmul.msk.f32.gmra.mxu0 %vm251_vm0, %v230_v21  ;;  %782 = vmatmul.msk.f32.gmra.mxu3 %vm251_vm0, %v240_v24 }
  0x5b   : > { %773 = vmatmul.msk.f32.gmra.mxu0 %vm251_vm0, %v231_v23  ;;  %783 = vmatmul.msk.f32.gmra.mxu3 %vm251_vm0, %v241_v26 }
  0x63   : > { %774 = vmatmul.msk.f32.gmra.mxu0 %vm251_vm0, %v232_v25  ;;  %784 = vmatmul.msk.f32.gmra.mxu3 %vm251_vm0, %v242_v27 }
  0x79   : > { %v625_v30 = vpop.permute.xlu2 %624 }
  0x81   : > { %v630_v42 = vpop.permute.xlu2 %629 }
  0x8f   : > { %v593_v27 = vpop.permute.xlu0 %592 }
  0x97   : > { %v598_v39 = vpop.permute.xlu0 %597 }
  0x98   : > { %v329_v32 = vpop.f32.mrf.mxu0 }
  0x9e   : > { %v359_v43 = vpop.f32.mrf.mxu3 }
  0xa0   : > { %v332_v33 = vpop.f32.mrf.mxu0 }
  0xa6   : > { %v362_v47 = vpop.f32.mrf.mxu3 }
  0xa8   : > { %v978_v36 = vpop.f32.mrf.mxu0 }
  0xae   : > { %v365_v53 = vpop.f32.mrf.mxu3 }
  0xb0   : > { %v983_v38 = vpop.f32.mrf.mxu0 }
  0xb6   : > { %v368_v59 = vpop.f32.mrf.mxu3 }
  0xb8   : > { %v341_v45 = vpop.f32.mrf.mxu0 }
  0xb9   : > { %789 = vmatmul.msk.f32.vlgmr.msra.gmra.mxu1 %vm398_vm1, %v341_v45 }
  0xba   : > { %560 = vmatpush.msra.mxu1 %v808_v46 }
  0xbc   : > { %561 = vmatpush.msra.mxu1 %v807_v51  ;;  %v635_v51 = vpop.permute.xlu0 %634 }
  0xbe   : > { %562 = vmatpush.msra.mxu1 %v806_v55  ;;  %v371_v62 = vpop.f32.mrf.mxu3 }
  0xc0   : > { %v344_v49 = vpop.f32.mrf.mxu0  ;;  %563 = vmatpush.msra.mxu1 %v805_v58 }
  0xc1   : > { %790 = vmatmul.msk.f32.vlgmr.msra.gmra.mxu2 %vm398_vm1, %v344_v49 }
  0xc2   : > { %666 = vmatpush.msra.mxu2 %v816_v48 }
  0xc4   : > { %667 = vmatpush.msra.mxu2 %v815_v50 }
  0xc6   : > { %668 = vmatpush.msra.mxu2 %v814_v54  ;;  %v374_v2 = vpop.f32.mrf.mxu3 }
  0xc8   : > { %v347_v52 = vpop.f32.mrf.mxu0  ;;  %669 = vmatpush.msra.mxu2 %v813_v57 }
  0xc9   : > { %791 = vmatmul.msk.f32.gmra.mxu2 %vm398_vm1, %v347_v52 }
  0xce   : > { %v377_v5 = vpop.f32.mrf.mxu3 }
  0xd0   : > { %v350_v56 = vpop.f32.mrf.mxu0 }
  0xd1   : > { %792 = vmatmul.msk.f32.gmra.mxu2 %vm398_vm1, %v350_v56 }
  0xd6   : > { %v380_v10 = vpop.f32.mrf.mxu3 }
  0xd8   : > { %v353_v60 = vpop.f32.mrf.mxu0 }
  0xd9   : > { %793 = vmatmul.msk.f32.vlgmr.msrb.gmra.mxu2 %vm398_vm1, %v329_v32  ;;  %801 = vmatmul.msk.f32.vlgmr.msrb.gmra.mxu1 %vm398_vm1, %v353_v60 }
  0xde   : > { %v383_v11 = vpop.f32.mrf.mxu3 }
  0xe0   : > { %v356_v63 = vpop.f32.mrf.mxu0 }
  0xe1   : > { %794 = vmatmul.msk.f32.gmra.mxu2 %vm398_vm1, %v332_v33  ;;  %802 = vmatmul.msk.f32.gmra.mxu1 %vm398_vm1, %v356_v63 }
  0xe6   : > { %v386_v12 = vpop.f32.mrf.mxu3 }
  0xe9   : > { %795 = vmatmul.msk.f32.gmra.mxu2 %vm398_vm1, %v978_v36  ;;  %803 = vmatmul.msk.f32.gmra.mxu1 %vm398_vm1, %v359_v43 }
  0xf1   : > { %796 = vmatmul.msk.f32.gmra.mxu2 %vm398_vm1, %v983_v38  ;;  %804 = vmatmul.msk.f32.gmra.mxu1 %vm398_vm1, %v362_v47  ;;  %v603_v38 = vpop.permute.xlu1 %602 }
  0xf9   : > { %809 = vmatmul.msk.f32.vlgmr.msra.gmra.mxu1 %vm398_vm1, %v365_v53  ;;  %817 = vmatmul.msk.f32.vlgmr.msra.gmra.mxu2 %vm398_vm1, %v377_v5  ;;  %v608_v50 = vpop.permute.xlu1 %607 }
 0x101   : > { %810 = vmatmul.msk.f32.gmra.mxu1 %vm398_vm1, %v368_v59  ;;  %818 = vmatmul.msk.f32.gmra.mxu2 %vm398_vm1, %v380_v10  ;;  %v640_v58 = vpop.permute.xlu1 %639 }
 0x109   : > { %811 = vmatmul.msk.f32.gmra.mxu1 %vm398_vm1, %v371_v62  ;;  %819 = vmatmul.msk.f32.gmra.mxu2 %vm398_vm1, %v383_v11 }
 0x111   : > { %812 = vmatmul.msk.f32.gmra.mxu1 %vm398_vm1, %v374_v2  ;;  %820 = vmatmul.msk.f32.gmra.mxu2 %vm398_vm1, %v386_v12 }
 0x136   : > { %v428_v15 = vpop.f32.mrf.mxu1 }
 0x144   : > { %v431_v13 = vpop.f32.mrf.mxu2 }
 0x14c   : > { %v434_v14 = vpop.f32.mrf.mxu2 }
 0x154   : > { %v437_v16 = vpop.f32.mrf.mxu2 }
 0x156   : > { %v515_v17 = vpop.f32.mrf.mxu1 }
 0x15c   : > { %v469_v18 = vpop.f32.mrf.mxu2 }
 0x15d   : > { %v470_v24 = vadd.f32 %v469_v18, %v428_v15 }
 0x15e   : > { %v518_v19 = vpop.f32.mrf.mxu1 }
 0x15f   : > { %v527_v26 = vadd.f32 %v515_v17, %v470_v24 }
 0x164   : > { %v472_v20 = vpop.f32.mrf.mxu2 }
 0x165   : > { %v473_v31 = vadd.f32 %v472_v20, %v431_v13 }
 0x166   : > { %v521_v21 = vpop.f32.mrf.mxu1 }
 0x167   : > { %v528_v35 = vadd.f32 %v518_v19, %v473_v31 }
 0x16c   : > { %v475_v22 = vpop.f32.mrf.mxu2 }
 0x16d   : > { %v476_v40 = vadd.f32 %v475_v22, %v434_v14 }
 0x16e   : > { %v524_v23 = vpop.f32.mrf.mxu1 }
 0x16f   : > { %v529_v45 = vadd.f32 %v521_v21, %v476_v40 }
 0x174   : > { %v478_v25 = vpop.f32.mrf.mxu2 }
 0x175   : > { %v479_v48 = vadd.f32 %v478_v25, %v437_v16 }
 0x176   : > { %v565_v28 = vpop.f32.mrf.mxu1 }
 0x177   : > { %v577_v29 = vadd.f32 %v565_v28, %v527_v26  ;;  %v530_v54 = vadd.f32 %v524_v23, %v479_v48 }
 0x179   : > { %v610_v32 = vadd.f32 %v593_v27, %v577_v29 }
 0x17b   : > { %614 = vst.msk [vmem:[%s1061_s10] sm:$0xff] %vm251_vm0, %v610_v32 }
 0x17c   : > { %v671_v33 = vpop.f32.mrf.mxu2 }
 0x17d   : > { %v672_v34 = vadd.f32 %v671_v33, %v625_v30 }
 0x17e   : > { %v568_v36 = vpop.f32.mrf.mxu1 }
 0x17f   : > { %683 = vst.msk [vmem:[%s1061_s10 + $0x20] sm:$0xff] %vm251_vm0, %v672_v34  ;;  %v578_v37 = vadd.f32 %v568_v36, %v528_v35 }
 0x181   : > { %v611_v41 = vadd.f32 %v598_v39, %v578_v37 }
 0x183   : > { %615 = vst.msk [vmem:[%s1061_s10 + $0x8] sm:$0xff] %vm251_vm0, %v611_v41 }
 0x184   : > { %v674_v43 = vpop.f32.mrf.mxu2 }
 0x185   : > { %v675_v44 = vadd.f32 %v674_v43, %v630_v42 }
 0x186   : > { %v571_v46 = vpop.f32.mrf.mxu1 }
 0x187   : > { %684 = vst.msk [vmem:[%s1061_s10 + $0x28] sm:$0xff] %vm251_vm0, %v675_v44  ;;  %v579_v47 = vadd.f32 %v571_v46, %v529_v45 }
 0x189   : > { %v612_v49 = vadd.f32 %v603_v38, %v579_v47 }
 0x18b   : > { %616 = vst.msk [vmem:[%s1061_s10 + $0x10] sm:$0xff] %vm251_vm0, %v612_v49 }
 0x18c   : > { %v677_v52 = vpop.f32.mrf.mxu2 }
 0x18d   : > { %v678_v53 = vadd.f32 %v677_v52, %v635_v51 }
 0x18e   : > { %v574_v55 = vpop.f32.mrf.mxu1 }
 0x18f   : > { %685 = vst.msk [vmem:[%s1061_s10 + $0x30] sm:$0xff] %vm251_vm0, %v678_v53  ;;  %v580_v56 = vadd.f32 %v574_v55, %v530_v54 }
 0x191   : > { %v613_v57 = vadd.f32 %v608_v50, %v580_v56 }
 0x193   : > { %617 = vst.msk [vmem:[%s1061_s10 + $0x18] sm:$0xff] %vm251_vm0, %v613_v57 }
 0x194   : > { %v680_v59 = vpop.f32.mrf.mxu2 }
 0x195   : > { %v681_v60 = vadd.f32 %v680_v59, %v640_v58 }
 0x197   : > { %686 = vst.msk [vmem:[%s1061_s10 + $0x38] sm:$0xff] %vm251_vm0, %v681_v60 }
 0x198 PF: > { %s14_s15 = sadd.s32 1, %s853_s15  }
 0x199   : > { %p11_p5 = scmp.ge.s32.totalorder %s14_s15, 6  }
 0x19b   :  { %13 = sbr.rel (!%p11_p5) target bundleno = 1 (0x1), region = 73 }

</bundles_post_ra>
